<compile_context>
chip_gen: v7x
topology: tpu7x:2x2x1
jax: 0.10.0
libtpu: 0.0.40
codegen_flags: <defaults>
</compile_context>

<pallas_src>
import jax
import jax.numpy as jnp
from jax.experimental import pallas as pl
from jax.experimental.pallas import tpu as pltpu


def _attention_kernel(x_ref, wq_ref, wk_ref, wv_ref, wp_ref, bp_ref, o_ref):
    """One grid step == one batch element.

    x_ref  : (N, C)      tokens (leading batch dim squeezed away)
    wq_ref : (H, C, hd)  head-major q weight, softmax scale pre-folded
    wk_ref : (H, C, hd)  head-major k weight
    wv_ref : (H, C, hd)  head-major v weight
    wp_ref : (H, hd, C)  head-major proj weight (head concat folded into contraction)
    bp_ref : (1, C)      proj bias
    o_ref  : (N, C)      output tokens
    """
    x = x_ref[...]
    H = wq_ref.shape[0]
    N, C = x.shape

    # Broadcast tokens across heads once; all per-head work is batched matmuls.
    xb = jnp.broadcast_to(x[None, :, :], (H, N, C))            # (H, N, C)

    q = jnp.einsum('hnc,hcd->hnd', xb, wq_ref[...],
                   preferred_element_type=jnp.float32)         # (H, N, hd), pre-scaled
    k = jnp.einsum('hnc,hcd->hnd', xb, wk_ref[...],
                   preferred_element_type=jnp.float32)         # (H, N, hd)
    v = jnp.einsum('hnc,hcd->hnd', xb, wv_ref[...],
                   preferred_element_type=jnp.float32)         # (H, N, hd)

    # scores: contract last dims directly (no k transpose through the XLU).
    s = jnp.einsum('hnd,hmd->hnm', q, k,
                   preferred_element_type=jnp.float32)         # (H, N, N)

    # softmax (max-subtracted; scale already folded into wq).
    s = s - jnp.max(s, axis=-1, keepdims=True)
    p = jnp.exp(s)
    p = p * pl.reciprocal(jnp.sum(p, axis=-1, keepdims=True), approx=True)

    ctx = jnp.einsum('hnm,hmd->hnd', p, v,
                     preferred_element_type=jnp.float32)       # (H, N, hd)

    # Projection with the head concat folded in: batched (N,hd)@(hd,C) per head,
    # then reduce over the leading head axis (cheap outer-dim sum, no relayout).
    proj = jnp.einsum('hnd,hdc->hnc', ctx, wp_ref[...],
                      preferred_element_type=jnp.float32)      # (H, N, C)
    out = jnp.sum(proj, axis=0) + bp_ref[...]                  # (N, C)

    o_ref[...] = out.astype(o_ref.dtype)
    # attn_drop / proj_drop have p=0.0 in the module defaults -> identity (eval no-op).


def attention_pallas(x, w_qkv, w_proj, b_proj, *, num_heads, param_dtype=None):
    """x: (B, N, C); w_qkv: (3C, C) torch Linear layout; w_proj: (C, C); b_proj: (C,)."""
    B, N, C = x.shape
    head_dim = C // num_heads
    scale = head_dim ** (-0.5)
    out_dtype = x.dtype

    # Head-major weight prep (layout plumbing done once, outside the kernel):
    #   wq/wk/wv[h, c_in, d] = w_qkv[s*C + h*hd + d, c_in]   (s = 0/1/2 -> q/k/v)
    w3 = jnp.transpose(w_qkv.reshape(3, num_heads, head_dim, C), (0, 1, 3, 2))
    wq = w3[0] * scale          # fold softmax scale into q weight
    wk = w3[1]
    wv = w3[2]
    #   wp[h, d, c_out] = w_proj[c_out, h*hd + d]  (folds head concat into proj)
    wp = jnp.transpose(w_proj).reshape(num_heads, head_dim, C)
    bp = b_proj.reshape(1, C)

    if param_dtype is not None:   # e.g. jnp.bfloat16 on v6e/v7x; accum stays f32
        x, wq, wk, wv, wp = (a.astype(param_dtype) for a in (x, wq, wk, wv, wp))

    return pl.pallas_call(
        _attention_kernel,
        out_shape=jax.ShapeDtypeStruct((B, N, C), out_dtype),
        grid_spec=pltpu.PrefetchScalarGridSpec(
            num_scalar_prefetch=0,
            grid=(B,),  # "parallel" over batch: 2-wide -> shards across v7x's 2 TCs;
                        # only B serial steps on single-TC v5e/v6e.
            in_specs=[
                pl.BlockSpec((None, N, C), lambda b: (b, 0, 0)),
                pl.BlockSpec((num_heads, C, head_dim), lambda b: (0, 0, 0)),
                pl.BlockSpec((num_heads, C, head_dim), lambda b: (0, 0, 0)),
                pl.BlockSpec((num_heads, C, head_dim), lambda b: (0, 0, 0)),
                pl.BlockSpec((num_heads, head_dim, C), lambda b: (0, 0, 0)),
                pl.BlockSpec((1, C), lambda b: (0, 0)),
            ],
            out_specs=pl.BlockSpec((None, N, C), lambda b: (b, 0, 0)),
        ),
        compiler_params=pltpu.CompilerParams(
            dimension_semantics=("parallel",),
            vmem_limit_bytes=32 * 1024 * 1024,
        ),
    )(x, wq, wk, wv, wp, bp)


def attention_reference(x, w_qkv, w_proj, b_proj, *, num_heads):
    """Pure-JAX reference mirroring the PyTorch forward."""
    B, N, C = x.shape
    head_dim = C // num_heads
    scale = head_dim ** (-0.5)
    qkv = jnp.einsum("bnc,oc->bno", x, w_qkv)                    # (B, N, 3C)
    qkv = qkv.reshape(B, N, 3, num_heads, head_dim)
    qkv = jnp.transpose(qkv, (2, 0, 3, 1, 4))                    # (3, B, H, N, hd)
    q, k, v = qkv[0], qkv[1], qkv[2]
    attn = jnp.einsum("bhnd,bhmd->bhnm", q, k) * scale
    attn = jax.nn.softmax(attn, axis=-1)
    out = jnp.einsum("bhnm,bhmd->bhnd", attn, v)
    out = jnp.transpose(out, (0, 2, 1, 3)).reshape(B, N, C)
    out = jnp.einsum("bnc,oc->bno", out, w_proj) + b_proj
    return out


if __name__ == "__main__":
    # Small shapes consistent with the module: B=2, N=8 tokens, dim C=32, 4 heads.
    B, N, C = 2, 8, 32
    num_heads = 4

    key = jax.random.PRNGKey(0)
    kx, kq, kp, kb = jax.random.split(key, 4)
    x = jax.random.normal(kx, (B, N, C), dtype=jnp.float32)
    w_qkv = jax.random.normal(kq, (3 * C, C), dtype=jnp.float32) * 0.05   # torch (out, in)
    w_proj = jax.random.normal(kp, (C, C), dtype=jnp.float32) * 0.05
    b_proj = jax.random.normal(kb, (C,), dtype=jnp.float32) * 0.01

    out = attention_pallas(x, w_qkv, w_proj, b_proj, num_heads=num_heads)
    out = jax.block_until_ready(out)

    ref = attention_reference(x, w_qkv, w_proj, b_proj, num_heads=num_heads)
    # Tolerance loosened slightly vs 1e-4: approx reciprocal + folded scale drift.
    assert out.shape == ref.shape
    assert jnp.allclose(out, ref, atol=2e-3, rtol=2e-3), "mismatch vs reference"

    print("KERNEL_OK")
</pallas_src>

<mosaic_0001>
module attributes {stable_mosaic.version = 11 : i64} {
  func.func @_attention_kernel(%arg0: i32, %arg1: memref<1x8x32xf32, #tpu.memory_space<vmem>>, %arg2: memref<4x32x8xf32, #tpu.memory_space<vmem>>, %arg3: memref<4x32x8xf32, #tpu.memory_space<vmem>>, %arg4: memref<4x32x8xf32, #tpu.memory_space<vmem>>, %arg5: memref<4x8x32xf32, #tpu.memory_space<vmem>>, %arg6: memref<1x32xf32, #tpu.memory_space<vmem>>, %arg7: memref<1x8x32xf32, #tpu.memory_space<vmem>>) attributes {dimension_semantics = [#tpu.dimension_semantics<parallel>], iteration_bounds = array<i64: 2>, scalar_prefetch = 0 : i64, scratch_operands = 0 : i64, tpu.core_type = #tpu.core_type<tc>, window_params = [{transform_indices = @transform_0, window_bounds = array<i64: 1, 8, 32>}, {pipeline_mode = #tpu.pipeline_mode<synchronous>, transform_indices = @transform_1, window_bounds = array<i64: 4, 32, 8>}, {pipeline_mode = #tpu.pipeline_mode<synchronous>, transform_indices = @transform_2, window_bounds = array<i64: 4, 32, 8>}, {pipeline_mode = #tpu.pipeline_mode<synchronous>, transform_indices = @transform_3, window_bounds = array<i64: 4, 32, 8>}, {pipeline_mode = #tpu.pipeline_mode<synchronous>, transform_indices = @transform_4, window_bounds = array<i64: 4, 8, 32>}, {pipeline_mode = #tpu.pipeline_mode<synchronous>, transform_indices = @transform_5, window_bounds = array<i64: 1, 32>}, {transform_indices = @transform_6, window_bounds = array<i64: 1, 8, 32>}]} {
    %c0 = arith.constant 0 : index
    %c0_0 = arith.constant 0 : index
    %c0_1 = arith.constant 0 : index
    %0 = vector.load %arg1[%c0, %c0_0, %c0_1] : memref<1x8x32xf32, #tpu.memory_space<vmem>>, vector<1x8x32xf32>
    %1 = vector.shape_cast %0 : vector<1x8x32xf32> to vector<8x32xf32>
    %2 = vector.shape_cast %1 : vector<8x32xf32> to vector<1x8x32xf32>
    %3 = vector.shape_cast %2 : vector<1x8x32xf32> to vector<1x8x32xf32>
    %4 = vector.broadcast %3 : vector<1x8x32xf32> to vector<4x8x32xf32>
    %c0_2 = arith.constant 0 : index
    %c0_3 = arith.constant 0 : index
    %c0_4 = arith.constant 0 : index
    %5 = vector.load %arg2[%c0_2, %c0_3, %c0_4] : memref<4x32x8xf32, #tpu.memory_space<vmem>>, vector<4x32x8xf32>
    "tpu.trace_start"() <{level = 10 : i32, message = "hnc,hcd->hnd"}> : () -> ()
    %cst = arith.constant dense<0.000000e+00> : vector<4x8x8xf32>
    %6 = tpu.matmul %4, %5, %cst {dimension_numbers = #tpu.dot_dimension_numbers<[2], [1], [1], [2], [0, 0, 0, 1, 1, 2], [0], [0]>} : vector<4x8x32xf32>, vector<4x32x8xf32>, vector<4x8x8xf32> -> vector<4x8x8xf32>
    "tpu.trace_stop"() : () -> ()
    %c0_5 = arith.constant 0 : index
    %c0_6 = arith.constant 0 : index
    %c0_7 = arith.constant 0 : index
    %7 = vector.load %arg3[%c0_5, %c0_6, %c0_7] : memref<4x32x8xf32, #tpu.memory_space<vmem>>, vector<4x32x8xf32>
    "tpu.trace_start"() <{level = 10 : i32, message = "hnc,hcd->hnd"}> : () -> ()
    %cst_8 = arith.constant dense<0.000000e+00> : vector<4x8x8xf32>
    %8 = tpu.matmul %4, %7, %cst_8 {dimension_numbers = #tpu.dot_dimension_numbers<[2], [1], [1], [2], [0, 0, 0, 1, 1, 2], [0], [0]>} : vector<4x8x32xf32>, vector<4x32x8xf32>, vector<4x8x8xf32> -> vector<4x8x8xf32>
    "tpu.trace_stop"() : () -> ()
    %c0_9 = arith.constant 0 : index
    %c0_10 = arith.constant 0 : index
    %c0_11 = arith.constant 0 : index
    %9 = vector.load %arg4[%c0_9, %c0_10, %c0_11] : memref<4x32x8xf32, #tpu.memory_space<vmem>>, vector<4x32x8xf32>
    "tpu.trace_start"() <{level = 10 : i32, message = "hnc,hcd->hnd"}> : () -> ()
    %cst_12 = arith.constant dense<0.000000e+00> : vector<4x8x8xf32>
    %10 = tpu.matmul %4, %9, %cst_12 {dimension_numbers = #tpu.dot_dimension_numbers<[2], [1], [1], [2], [0, 0, 0, 1, 1, 2], [0], [0]>} : vector<4x8x32xf32>, vector<4x32x8xf32>, vector<4x8x8xf32> -> vector<4x8x8xf32>
    "tpu.trace_stop"() : () -> ()
    "tpu.trace_start"() <{level = 10 : i32, message = "hnd,hmd->hnm"}> : () -> ()
    %cst_13 = arith.constant dense<0.000000e+00> : vector<4x8x8xf32>
    %11 = tpu.matmul %6, %8, %cst_13 {dimension_numbers = #tpu.dot_dimension_numbers<[2], [2], [1], [1], [0, 0, 0, 1, 1, 1], [0], [0]>} : vector<4x8x8xf32>, vector<4x8x8xf32>, vector<4x8x8xf32> -> vector<4x8x8xf32>
    "tpu.trace_stop"() : () -> ()
    %cst_14 = arith.constant dense<0xFF800000> : vector<4x8xf32>
    %12 = vector.multi_reduction <maximumf>, %11, %cst_14 [2] : vector<4x8x8xf32> to vector<4x8xf32>
    %13 = vector.shape_cast %12 : vector<4x8xf32> to vector<4x8x1xf32>
    %14 = vector.broadcast %13 : vector<4x8x1xf32> to vector<4x8x8xf32>
    %15 = arith.subf %11, %14 : vector<4x8x8xf32>
    %16 = math.exp %15 : vector<4x8x8xf32>
    %cst_15 = arith.constant dense<0.000000e+00> : vector<4x8xf32>
    %17 = vector.multi_reduction <add>, %16, %cst_15 [2] : vector<4x8x8xf32> to vector<4x8xf32>
    %18 = vector.shape_cast %17 : vector<4x8xf32> to vector<4x8x1xf32>
    %19 = tpu.reciprocal %18 {approx = true} : vector<4x8x1xf32> -> vector<4x8x1xf32>
    %20 = vector.broadcast %19 : vector<4x8x1xf32> to vector<4x8x8xf32>
    %21 = arith.mulf %16, %20 : vector<4x8x8xf32>
    "tpu.trace_start"() <{level = 10 : i32, message = "hnm,hmd->hnd"}> : () -> ()
    %cst_16 = arith.constant dense<0.000000e+00> : vector<4x8x8xf32>
    %22 = tpu.matmul %21, %10, %cst_16 {dimension_numbers = #tpu.dot_dimension_numbers<[2], [1], [1], [2], [0, 0, 0, 1, 1, 2], [0], [0]>} : vector<4x8x8xf32>, vector<4x8x8xf32>, vector<4x8x8xf32> -> vector<4x8x8xf32>
    "tpu.trace_stop"() : () -> ()
    %c0_17 = arith.constant 0 : index
    %c0_18 = arith.constant 0 : index
    %c0_19 = arith.constant 0 : index
    %23 = vector.load %arg5[%c0_17, %c0_18, %c0_19] : memref<4x8x32xf32, #tpu.memory_space<vmem>>, vector<4x8x32xf32>
    "tpu.trace_start"() <{level = 10 : i32, message = "hnd,hdc->hnc"}> : () -> ()
    %cst_20 = arith.constant dense<0.000000e+00> : vector<4x8x32xf32>
    %24 = tpu.matmul %22, %23, %cst_20 {dimension_numbers = #tpu.dot_dimension_numbers<[2], [1], [1], [2], [0, 0, 0, 1, 1, 2], [0], [0]>} : vector<4x8x8xf32>, vector<4x8x32xf32>, vector<4x8x32xf32> -> vector<4x8x32xf32>
    "tpu.trace_stop"() : () -> ()
    %cst_21 = arith.constant dense<0.000000e+00> : vector<8x32xf32>
    %25 = vector.multi_reduction <add>, %24, %cst_21 [0] : vector<4x8x32xf32> to vector<8x32xf32>
    %c0_22 = arith.constant 0 : index
    %c0_23 = arith.constant 0 : index
    %26 = vector.load %arg6[%c0_22, %c0_23] : memref<1x32xf32, #tpu.memory_space<vmem>>, vector<1x32xf32>
    %27 = vector.broadcast %26 : vector<1x32xf32> to vector<8x32xf32>
    %28 = arith.addf %25, %27 : vector<8x32xf32>
    %c0_24 = arith.constant 0 : index
    %c0_25 = arith.constant 0 : index
    %c0_26 = arith.constant 0 : index
    %29 = vector.load %arg7[%c0_24, %c0_25, %c0_26] : memref<1x8x32xf32, #tpu.memory_space<vmem>>, vector<1x8x32xf32>
    %30 = vector.shape_cast %29 : vector<1x8x32xf32> to vector<8x32xf32>
    %31 = vector.shape_cast %28 : vector<8x32xf32> to vector<1x8x32xf32>
    tpu.vector_store %arg7[%c0_24, %c0_25, %c0_26], %31 {strides = array<i32>} : memref<1x8x32xf32, #tpu.memory_space<vmem>>, vector<1x8x32xf32>,
    return
  }
  func.func @transform_0(%arg0: i32) -> (i32, i32, i32) {
    %c0_i32 = arith.constant 0 : i32
    %c0_i32_0 = arith.constant 0 : i32
    %c0_i32_1 = arith.constant 0 : i32
    return %arg0, %c0_i32, %c0_i32_0 : i32, i32, i32
  }
  func.func @transform_1(%arg0: i32) -> (i32, i32, i32) {
    %c0_i32 = arith.constant 0 : i32
    %c0_i32_0 = arith.constant 0 : i32
    %c0_i32_1 = arith.constant 0 : i32
    %c0_i32_2 = arith.constant 0 : i32
    return %c0_i32, %c0_i32_0, %c0_i32_1 : i32, i32, i32
  }
  func.func @transform_2(%arg0: i32) -> (i32, i32, i32) {
    %c0_i32 = arith.constant 0 : i32
    %c0_i32_0 = arith.constant 0 : i32
    %c0_i32_1 = arith.constant 0 : i32
    %c0_i32_2 = arith.constant 0 : i32
    return %c0_i32, %c0_i32_0, %c0_i32_1 : i32, i32, i32
  }
  func.func @transform_3(%arg0: i32) -> (i32, i32, i32) {
    %c0_i32 = arith.constant 0 : i32
    %c0_i32_0 = arith.constant 0 : i32
    %c0_i32_1 = arith.constant 0 : i32
    %c0_i32_2 = arith.constant 0 : i32
    return %c0_i32, %c0_i32_0, %c0_i32_1 : i32, i32, i32
  }
  func.func @transform_4(%arg0: i32) -> (i32, i32, i32) {
    %c0_i32 = arith.constant 0 : i32
    %c0_i32_0 = arith.constant 0 : i32
    %c0_i32_1 = arith.constant 0 : i32
    %c0_i32_2 = arith.constant 0 : i32
    return %c0_i32, %c0_i32_0, %c0_i32_1 : i32, i32, i32
  }
  func.func @transform_5(%arg0: i32) -> (i32, i32) {
    %c0_i32 = arith.constant 0 : i32
    %c0_i32_0 = arith.constant 0 : i32
    %c0_i32_1 = arith.constant 0 : i32
    return %c0_i32, %c0_i32_0 : i32, i32
  }
  func.func @transform_6(%arg0: i32) -> (i32, i32, i32) {
    %c0_i32 = arith.constant 0 : i32
    %c0_i32_0 = arith.constant 0 : i32
    %c0_i32_1 = arith.constant 0 : i32
    return %arg0, %c0_i32, %c0_i32_0 : i32, i32, i32
  }
}

</mosaic_0001>

<bundles_post_ra>
// kernel: tpu_custom_call.1
= control target key start
LH: loop header
LB: loop body
LE: loop exit
PB: predicated region body
PF: predicated region fallthrough
CT: control target
= control target key end

     0   :  { %11 = vsyncpa [#allocation3], 0  ;;  %s3115_s0 = inlined_call_operand.vmem [shape: f32[2,8,32], index: 0, kind: input, shape index: {}]   ;;  %s3116_s1 = inlined_call_operand.vmem [shape: f32[4,32,8], index: 1, kind: input, shape index: {}]   ;;  %s3117_s2 = inlined_call_operand.vmem [shape: f32[4,32,8], index: 2, kind: input, shape index: {}]   ;;  %s3118_s3 = inlined_call_operand.vmem [shape: f32[4,32,8], index: 3, kind: input, shape index: {}]   ;;  %s3119_s4 = inlined_call_operand.vmem [shape: f32[4,8,32], index: 4, kind: input, shape index: {}]   ;;  %s3120_s5 = inlined_call_operand.vmem [shape: f32[1,32], index: 5, kind: input, shape index: {}]   ;;  %s3121_s6 = inlined_call_operand.hbm [shape: f32[2,8,32], index: 6, kind: output, shape index: {}]  }
   0x1   :  { %13 = vsyncpa [#allocation3 + $0x1], 0  ;;  %s2714_s21 = smov 0   ;;  %s2716_s22 = smov 0  }
   0x2   :  { %s2718_s23 = smov 0   ;;  %s2720_s24 = smov 0  }
   0x3 LB: > { %s2735_s25 = sadd.s32 4294967295, %s2673_s24   ;;  %s2166_s26 = sadd.s32 4294967294, %s2673_s24   ;;  %s2673_s24 = sphi %s2720_s24, %s3127_s24   ;;  %s2669_s23 = sphi %s2718_s23, %s3126_s23   ;;  %s2665_s22 = sphi %s2716_s22, %s3125_s22   ;;  %s2661_s21 = sphi %s2714_s21, %s3124_s21  }
   0x4   : > { %s2739_s27 = sadd.s32 1, %s2673_s24   ;;  %s157_s28 = sadd.s32 1, %s2669_s23 }
   0x5   : > { %s154_s29 = ssub.s32 %s2673_s24, %s2739_s27  ;;  %p167_p0 = scmp.ne.s32.totalorder %s2669_s23, %s2665_s22 }
   0x6   : > { %p155_p1 = scmp.eq.s32.totalorder %s154_s29, 0  ;;  %p168_p2 = scmp.eq.s32.totalorder %s2735_s25, 1 }
   0x7   : > { %p173_p3 = scmp.ne.s32.totalorder %s2665_s22, %s2661_s21  ;;  %p174_p4 = scmp.eq.s32.totalorder %s2166_s26, 1 }
   0x8   : > { %s2750_s30 = scalar_select %p155_p1, %s2669_s23, %s157_s28  }
   0x9   : > { %p2752_p5 = por %p168_p2, %p167_p0  ;;  %p2756_p6 = por %p174_p4, %p173_p3 }
   0xa   : > { %p2169_p7 = scmp.ge.s32.totalorder %s2673_s24, 1  ;;  %p214_p8 = scmp.lt.s32.totalorder %s2673_s24, 3 }
   0xc   : > { %p215_p9 = pnand %p2169_p7, %p214_p8 }
   0xd   : > { %v248_v0 = vld [vmem:[%s3116_s1] sm:$0xff] (!%p215_p9)  ;;  %v249_v1 = vld [vmem:[%s3116_s1 + $0x8] sm:$0xff] (!%p215_p9)  ;;  %v2675_v3 = vmov (!%p215_p9), 0.0|0.0   ;;  %v250_v6 = vld [vmem:[%s3116_s1 + $0x10] sm:$0xff] (!%p215_p9)  ;;  %p243_p10 = scmp.lt.s32.totalorder (!%p215_p9), %s2735_s25, 1  ;;  %vm2676_vm0 = vmmov (!%p215_p9), 0  }
   0xe   : > { %218 = sbr.rel (%p215_p9) target bundleno = 1238 (0x4d6), region = 44  ;;  %v252_v2 = vld [vmem:[%s3116_s1 + $0x20] sm:$0xff] (!%p215_p9)  ;;  %2481 = vmatprep.subr.bf16.mxu0 (!%p215_p9), %v2675_v3  ;;  %2487 = vmatprep.subr.bf16.mxu1 (!%p215_p9), %v2675_v3  ;;  %v2482_v4 = vpack.c.bf16 (!%p215_p9), %v249_v1, %v248_v0  ;;  %v253_v5 = vld [vmem:[%s3116_s1 + $0x28] sm:$0xff] (!%p215_p9)  ;;  %v251_v7 = vld [vmem:[%s3116_s1 + $0x18] sm:$0xff] (!%p215_p9)  ;;  %v2677_v11 = vmov (!%p215_p9), 0.0   ;;  %vm264_vm1 = vcmask (!%p215_p9), 261120  }
   0xf   : > { %v2488_v8 = vpack.c.bf16 (!%p215_p9), %v253_v5, %v252_v2  ;;  %v254_v9 = vld [vmem:[%s3116_s1 + $0x30] sm:$0xff] (!%p215_p9)  ;;  %v255_v10 = vld [vmem:[%s3116_s1 + $0x38] sm:$0xff] (!%p215_p9)  ;;  %2297 = vmatprep.mubr.msk.f32.mxu0 (!%p215_p9), %vm2676_vm0, %v2677_v11  ;;  %2308 = vmatprep.mubr.msk.f32.mxu1 (!%p215_p9), %vm2676_vm0, %v2677_v11  ;;  %v2485_v12 = vpack.c.bf16 (!%p215_p9), %v251_v7, %v250_v6  ;;  %v256_v14 = vld [vmem:[%s3116_s1 + $0x40] sm:$0xff] (!%p215_p9)  ;;  %vm1140_vm2 = vcmask (!%p215_p9), 64512   ;;  %s240_s13 = sand.u32 (!%p215_p9), 1, %s2665_s22   ;;  %s2202_s17 = sshll.u32 (!%p215_p9), %s2735_s25, 7 }
  0x10   : > { %2483 = vmatpush3.bf16.msra.mxu0 (!%p215_p9), %v2482_v4  ;;  %v2491_v13 = vpack.c.bf16 (!%p215_p9), %v255_v10, %v254_v9  ;;  %v257_v15 = vld [vmem:[%s3116_s1 + $0x48] sm:$0xff] (!%p215_p9)  ;;  %v260_v16 = vld [vmem:[%s3116_s1 + $0x60] sm:$0xff] (!%p215_p9)  ;;  %v258_v21 = vld [vmem:[%s3116_s1 + $0x50] sm:$0xff] (!%p215_p9)  ;;  %s2170_s14 = sshll.u32 (!%p215_p9), %s240_s13, 3  ;;  %s2094_s29 = scalar_lea.sflag (!%p215_p9), [#allocation3], %s240_s13 }
  0x11   : > { %2489 = vmatpush3.bf16.msra.mxu1 (!%p215_p9), %v2488_v8  ;;  %2484 = vmatprep.subr.bf16.mxu0 (!%p215_p9), %v2675_v3  ;;  %v261_v17 = vld [vmem:[%s3116_s1 + $0x68] sm:$0xff] (!%p215_p9)  ;;  %v2494_v19 = vpack.c.bf16 (!%p215_p9), %v257_v15, %v256_v14  ;;  %v259_v22 = vld [vmem:[%s3116_s1 + $0x58] sm:$0xff] (!%p215_p9)  ;;  %v262_v23 = vld [vmem:[%s3116_s1 + $0x70] sm:$0xff] (!%p215_p9)  ;;  %s242_s18 = scalar_lea.vmem (!%p215_p9), [#allocation2], %s2170_s14 }
  0x12   : > { %2490 = vmatprep.subr.bf16.mxu1 (!%p215_p9), %v2675_v3  ;;  %v2500_v20 = vpack.c.bf16 (!%p215_p9), %v261_v17, %v260_v16  ;;  %v263_v24 = vld [vmem:[%s3116_s1 + $0x78] sm:$0xff] (!%p215_p9)  ;;  %v2497_v25 = vpack.c.bf16 (!%p215_p9), %v259_v22, %v258_v21  ;;  %v548_v27 = vld [vmem:[%s3117_s2] sm:$0xff] (!%p215_p9)  ;;  %v549_v28 = vld [vmem:[%s3117_s2 + $0x8] sm:$0xff] (!%p215_p9)  ;;  %s2107_s19 = sshll.u32 (!%p215_p9), %s242_s18, 4  ;;  %s3074_s19 = int_to_ptr.vmem [resolvable:$true] %s2107_s19 }
  0x13   : > { %v2503_v26 = vpack.c.bf16 (!%p215_p9), %v263_v24, %v262_v23  ;;  %v552_v29 = vld [vmem:[%s3117_s2 + $0x20] sm:$0xff] (!%p215_p9)  ;;  %v553_v30 = vld [vmem:[%s3117_s2 + $0x28] sm:$0xff] (!%p215_p9)  ;;  %v2506_v31 = vpack.c.bf16 (!%p215_p9), %v549_v28, %v548_v27  ;;  %v550_v33 = vld [vmem:[%s3117_s2 + $0x10] sm:$0xff] (!%p215_p9)  ;;  %s2611_s9 = scalar_lea.vmem (!%p215_p9), %s3074_s19, 128 }
  0x14   : > { %2486 = vmatpush3.bf16.msra.mxu0 (!%p215_p9), %v2485_v12  ;;  %v2512_v32 = vpack.c.bf16 (!%p215_p9), %v553_v30, %v552_v29  ;;  %v551_v34 = vld [vmem:[%s3117_s2 + $0x18] sm:$0xff] (!%p215_p9)  ;;  %v554_v35 = vld [vmem:[%s3117_s2 + $0x30] sm:$0xff] (!%p215_p9)  ;;  %v556_v39 = vld [vmem:[%s3117_s2 + $0x40] sm:$0xff] (!%p215_p9)  ;;  %p2612_p11 = scmp.ne.s32.totalorder (!%p215_p9), %s3074_s19, %s2611_s9 }
  0x15   : > { %s244_s10 = scalar_select %p243_p10, %s2735_s25, 1  ;;  %2492 = vmatpush3.bf16.msra.mxu1 %v2491_v13  ;;  %2493 = vmatprep.subr.bf16.mxu0 %v2675_v3  ;;  %v555_v36 = vld [vmem:[%s3117_s2 + $0x38] sm:$0xff]  ;;  %v2509_v37 = vpack.c.bf16 %v551_v34, %v550_v33  ;;  %v557_v40 = vld [vmem:[%s3117_s2 + $0x48] sm:$0xff]  ;;  %v560_v41 = vld [vmem:[%s3117_s2 + $0x60] sm:$0xff] }
  0x16   : > { %2499 = vmatprep.subr.bf16.mxu1 %v2675_v3  ;;  %v2515_v38 = vpack.c.bf16 %v555_v36, %v554_v35  ;;  %v561_v42 = vld [vmem:[%s3117_s2 + $0x68] sm:$0xff]  ;;  %v2518_v43 = vpack.c.bf16 %v557_v40, %v556_v39  ;;  %v558_v45 = vld [vmem:[%s3117_s2 + $0x50] sm:$0xff]  ;;  %v559_v46 = vld [vmem:[%s3117_s2 + $0x58] sm:$0xff]  ;;  %p2613_p12 = pnand %p2612_p11, %p2752_p5  ;;  %s2678_s25 = smov [#allocation2]  }
  0x17   : > { %s2171_s15 = sshll.u32 %s244_s10, 3  ;;  %v2524_v44 = vpack.c.bf16 %v561_v42, %v560_v41  ;;  %v562_v47 = vld [vmem:[%s3117_s2 + $0x70] sm:$0xff]  ;;  %v563_v48 = vld [vmem:[%s3117_s2 + $0x78] sm:$0xff]  ;;  %v2521_v49 = vpack.c.bf16 %v559_v46, %v558_v45  ;;  %v844_v51 = vld [vmem:[%s3118_s3] sm:$0xff]  ;;  %s2615_s10 = sshll.u32 %s2678_s25, 4  ;;  %s2616_s10 = int_to_ptr.vmem [resolvable:$false] %s2615_s10 }
  0x18   : > { %s246_s28 = scalar_lea.vmem %s3115_s0, %s2171_s15  ;;  %v2527_v50 = vpack.c.bf16 %v563_v48, %v562_v47  ;;  %v845_v52 = vld [vmem:[%s3118_s3 + $0x8] sm:$0xff]  ;;  %v848_v53 = vld [vmem:[%s3118_s3 + $0x20] sm:$0xff]  ;;  %v846_v57 = vld [vmem:[%s3118_s3 + $0x10] sm:$0xff]  ;;  %p2614_p13 = pneg %p2613_p12 }
  0x19   : > { %v2811_v18 = vld [vmem:[%s246_s28] sm:$0xff]  ;;  %v849_v54 = vld [vmem:[%s3118_s3 + $0x28] sm:$0xff]  ;;  %v2530_v55 = vpack.c.bf16 %v845_v52, %v844_v51  ;;  %v847_v58 = vld [vmem:[%s3118_s3 + $0x18] sm:$0xff]  ;;  %s3072_s28 = scalar_lea.hbm %s3121_s6, %s2202_s17  ;;  %s2617_s11 = scalar_lea.vmem %s2616_s10, 256 }
  0x1a   : > { %2298 = vmatmul.mubr.msk.f32.vlgmr.msra.gmra.mrb[0].mxu0 %vm264_vm1, %v2811_v18  ;;  %2309 = vmatmul.mubr.msk.f32.vlgmr.msra.gmra.mrb[0].mxu1 %vm264_vm1, %v2811_v18  ;;  %v2536_v56 = vpack.c.bf16 %v849_v54, %v848_v53  ;;  %v850_v59 = vld [vmem:[%s3118_s3 + $0x30] sm:$0xff]  ;;  %v2533_v60 = vpack.c.bf16 %v847_v58, %v846_v57  ;;  %v851_v61 = vld [vmem:[%s3118_s3 + $0x38] sm:$0xff]  ;;  %v852_v63 = vld [vmem:[%s3118_s3 + $0x40] sm:$0xff]  ;;  %p2618_p0 = scmp.lt.s32.totalorder %s3074_s19, %s2616_s10  ;;  %p2619_p1 = scmp.lt.s32.totalorder %s2617_s11, %s2611_s9 }
  0x1b   : > { %2495 = vmatpush3.bf16.msra.mxu0 %v2494_v19  ;;  %2501 = vmatpush3.bf16.msra.mxu1 %v2500_v20  ;;  %v2539_v62 = vpack.c.bf16 %v851_v61, %v850_v59  ;;  %v853_v0 = vld [vmem:[%s3118_s3 + $0x48] sm:$0xff]  ;;  %v856_v1 = vld [vmem:[%s3118_s3 + $0x60] sm:$0xff]  ;;  %v854_v6 = vld [vmem:[%s3118_s3 + $0x50] sm:$0xff] }
  0x1c   : > { %2496 = vmatprep.subr.bf16.mxu0 %v2675_v3  ;;  %2502 = vmatprep.subr.bf16.mxu1 %v2675_v3  ;;  %v2542_v2 = vpack.c.bf16 %v853_v0, %v852_v63  ;;  %v857_v4 = vld [vmem:[%s3118_s3 + $0x68] sm:$0xff]  ;;  %v855_v7 = vld [vmem:[%s3118_s3 + $0x58] sm:$0xff]  ;;  %v858_v8 = vld [vmem:[%s3118_s3 + $0x70] sm:$0xff]  ;;  %p2620_p2 = por %p2619_p1, %p2618_p0 }
  0x1d   : > { %2319 = vmatprep.mubr.msk.f32.mxu0 %vm2676_vm0, %v2677_v11  ;;  %2330 = vmatprep.mubr.msk.f32.mxu1 %vm2676_vm0, %v2677_v11  ;;  %v2548_v5 = vpack.c.bf16 %v857_v4, %v856_v1  ;;  %v2545_v9 = vpack.c.bf16 %v855_v7, %v854_v6  ;;  %v859_v10 = vld [vmem:[%s3118_s3 + $0x78] sm:$0xff] }
  0x1e   : > { %v2551_v12 = vpack.c.bf16 %v859_v10, %v858_v8  ;;  %p2621_p3 = pnand %p2620_p2, %p2614_p13 }
  0x1f   : > { %2498 = vmatpush3.bf16.msra.mxu0 %v2497_v25  ;;  %2504 = vmatpush3.bf16.msra.mxu1 %v2503_v26 }
  0x20   : > { %2505 = vmatprep.subr.bf16.mxu0 %v2675_v3  ;;  %2511 = vmatprep.subr.bf16.mxu1 %v2675_v3 }
  0x22   : > { %2320 = vmatmul.mubr.msk.f32.vlgmr.msra.gmra.mrb[2].mxu0 %vm264_vm1, %v2811_v18  ;;  %2331 = vmatmul.mubr.msk.f32.vlgmr.msra.gmra.mrb[2].mxu1 %vm264_vm1, %v2811_v18 }
  0x23   : > { %2507 = vmatpush3.bf16.msra.mxu0 %v2506_v31  ;;  %2513 = vmatpush3.bf16.msra.mxu1 %v2512_v32 }
  0x24   : > { %2508 = vmatprep.subr.bf16.mxu0 %v2675_v3  ;;  %2514 = vmatprep.subr.bf16.mxu1 %v2675_v3 }
  0x25   : > { %2341 = vmatprep.mubr.msk.f32.mxu0 %vm2676_vm0, %v2677_v11  ;;  %2352 = vmatprep.mubr.msk.f32.mxu1 %vm2676_vm0, %v2677_v11 }
  0x27   : > { %2510 = vmatpush3.bf16.msra.mxu0 %v2509_v37  ;;  %2516 = vmatpush3.bf16.msra.mxu1 %v2515_v38 }
  0x28   : > { %2517 = vmatprep.subr.bf16.mxu0 %v2675_v3  ;;  %2523 = vmatprep.subr.bf16.mxu1 %v2675_v3 }
  0x2a   : > { %2342 = vmatmul.mubr.msk.f32.vlgmr.msra.gmra.mrb[4].mxu0 %vm264_vm1, %v2811_v18  ;;  %2353 = vmatmul.mubr.msk.f32.vlgmr.msra.gmra.mrb[4].mxu1 %vm264_vm1, %v2811_v18 }
  0x2b   : > { %2519 = vmatpush3.bf16.msra.mxu0 %v2518_v43  ;;  %2525 = vmatpush3.bf16.msra.mxu1 %v2524_v44 }
  0x2c   : > { %2520 = vmatprep.subr.bf16.mxu0 %v2675_v3  ;;  %2526 = vmatprep.subr.bf16.mxu1 %v2675_v3 }
  0x2d   : > { %2363 = vmatprep.mubr.msk.f32.mxu0 %vm2676_vm0, %v2677_v11  ;;  %2374 = vmatprep.mubr.msk.f32.mxu1 %vm2676_vm0, %v2677_v11 }
  0x2f   : > { %2522 = vmatpush3.bf16.msra.mxu0 %v2521_v49  ;;  %2528 = vmatpush3.bf16.msra.mxu1 %v2527_v50 }
  0x30   : > { %2529 = vmatprep.subr.bf16.mxu0 %v2675_v3  ;;  %2535 = vmatprep.subr.bf16.mxu1 %v2675_v3 }
  0x32   : > { %2364 = vmatmul.mubr.msk.f32.vlgmr.msra.gmra.mrb[6].mxu0 %vm264_vm1, %v2811_v18  ;;  %2375 = vmatmul.mubr.msk.f32.vlgmr.msra.gmra.mrb[6].mxu1 %vm264_vm1, %v2811_v18 }
  0x33   : > { %2531 = vmatpush3.bf16.msra.mxu0 %v2530_v55  ;;  %2537 = vmatpush3.bf16.msra.mxu1 %v2536_v56 }
  0x34   : > { %2532 = vmatprep.subr.bf16.mxu0 %v2675_v3  ;;  %2538 = vmatprep.subr.bf16.mxu1 %v2675_v3 }
  0x35   : > { %2385 = vmatprep.mubr.msk.f32.mxu0 %vm2676_vm0, %v2677_v11  ;;  %2396 = vmatprep.mubr.msk.f32.mxu1 %vm2676_vm0, %v2677_v11 }
  0x37   : > { %2534 = vmatpush3.bf16.msra.mxu0 %v2533_v60  ;;  %2540 = vmatpush3.bf16.msra.mxu1 %v2539_v62 }
  0x38   : > { %2541 = vmatprep.subr.bf16.mxu0 %v2675_v3  ;;  %2547 = vmatprep.subr.bf16.mxu1 %v2675_v3 }
  0x3a   : > { %2386 = vmatmul.mubr.msk.f32.vlgmr.msra.gmra.mrb[8].mxu0 %vm264_vm1, %v2811_v18  ;;  %2397 = vmatmul.mubr.msk.f32.vlgmr.msra.gmra.mrb[8].mxu1 %vm264_vm1, %v2811_v18 }
  0x3b   : > { %2543 = vmatpush3.bf16.msra.mxu0 %v2542_v2  ;;  %2549 = vmatpush3.bf16.msra.mxu1 %v2548_v5 }
  0x3c   : > { %2544 = vmatprep.subr.bf16.mxu0 %v2675_v3  ;;  %2550 = vmatprep.subr.bf16.mxu1 %v2675_v3 }
  0x3d   : > { %2407 = vmatprep.mubr.msk.f32.mxu0 %vm2676_vm0, %v2677_v11  ;;  %2418 = vmatprep.mubr.msk.f32.mxu1 %vm2676_vm0, %v2677_v11 }
  0x3f   : > { %2546 = vmatpush3.bf16.msra.mxu0 %v2545_v9  ;;  %2552 = vmatpush3.bf16.msra.mxu1 %v2551_v12 }
  0x40   : > { %2421 = vmatprep.subr.mxu0 %v2677_v11  ;;  %2426 = vmatprep.subr.mxu1 %v2677_v11 }
  0x42   : > { %2408 = vmatmul.mubr.msk.f32.vlgmr.msra.gmra.mrb[10].mxu0 %vm264_vm1, %v2811_v18  ;;  %2419 = vmatmul.mubr.msk.f32.vlgmr.msra.gmra.mrb[10].mxu1 %vm264_vm1, %v2811_v18 }
  0x43   : > { %2423 = vmatprep.mubr.msk.f32.mxu0 %vm2676_vm0, %v2677_v11  ;;  %2428 = vmatprep.mubr.msk.f32.mxu1 %vm2676_vm0, %v2677_v11 }
  0xed   : > { %v334_v3 = vpop.f32.mrb[0].mxu0  ;;  %v404_v14 = vpop.f32.mrb[0].mxu1 }
  0xee   : > { %v2299_v13 = vpop.f32.mrb[1].mxu0  ;;  %v2310_v15 = vpop.f32.mrb[1].mxu1 }
  0xf5   : > { %v474_v16 = vpop.f32.mrb[2].mxu0  ;;  %v544_v19 = vpop.f32.mrb[2].mxu1 }
  0xf6   : > { %v2321_v17 = vpop.f32.mrb[3].mxu0  ;;  %v2332_v20 = vpop.f32.mrb[3].mxu1 }
  0xf7   : > { %v1781_v17 = vld [vmem:[%s3119_s4] sm:$0xff]  ;;  %v1783_v20 = vld [vmem:[%s3119_s4 + $0x10] sm:$0xff] }
  0xfd   : > { %v630_v21 = vpop.f32.mrb[4].mxu0  ;;  %v700_v22 = vpop.f32.mrb[4].mxu1 }
  0xfe   : > { %v2343_v23 = vpop.f32.mrb[5].mxu0  ;;  %2422 = vmatpush3.xpose.msk.msra.mxu0 %vm1140_vm2, %v630_v21  ;;  %2427 = vmatpush3.xpose.msk.msra.mxu1 %vm1140_vm2, %v700_v22  ;;  %v2354_v18 = vpop.f32.mrb[5].mxu1 }
  0xff   : > { %2431 = vmatprep.subr.mxu0 %v2677_v11  ;;  %2436 = vmatprep.subr.mxu1 %v2677_v11  ;;  %v1784_v23 = vld [vmem:[%s3119_s4 + $0x18] sm:$0xff] }
 0x101   : > { %2424 = vmatmul.mubr.msk.f32.vlgmr.msra.gmra.mrb[12].mxu0 %vm1140_vm2, %v334_v3  ;;  %2429 = vmatmul.mubr.msk.f32.vlgmr.msra.gmra.mrb[12].mxu1 %vm1140_vm2, %v404_v14 }
 0x102   : > { %2433 = vmatprep.mubr.msk.f32.mxu0 %vm2676_vm0, %v2677_v11  ;;  %2438 = vmatprep.mubr.msk.f32.mxu1 %vm2676_vm0, %v2677_v11 }
 0x105   : > { %v770_v24 = vpop.f32.mrb[6].mxu0  ;;  %v840_v25 = vpop.f32.mrb[6].mxu1 }
 0x106   : > { %v2365_v26 = vpop.f32.mrb[7].mxu0  ;;  %2432 = vmatpush3.xpose.msk.msra.mxu0 %vm1140_vm2, %v770_v24  ;;  %2437 = vmatpush3.xpose.msk.msra.mxu1 %vm1140_vm2, %v840_v25  ;;  %v2376_v27 = vpop.f32.mrb[7].mxu1 }
 0x107   : > { %2441 = vmatprep.subr.mxu0 %v2677_v11  ;;  %2446 = vmatprep.subr.mxu1 %v2677_v11 }
 0x109   : > { %2434 = vmatmul.mubr.msk.f32.vlgmr.msra.gmra.mrb[14].mxu0 %vm1140_vm2, %v474_v16  ;;  %2439 = vmatmul.mubr.msk.f32.vlgmr.msra.gmra.mrb[14].mxu1 %vm1140_vm2, %v544_v19  ;;  %v1782_v19 = vld [vmem:[%s3119_s4 + $0x8] sm:$0xff] }
 0x10a   : > { %2443 = vmatprep.mubr.msk.f32.mxu0 %vm2676_vm0, %v2677_v11  ;;  %2448 = vmatprep.mubr.msk.f32.mxu1 %vm2676_vm0, %v2677_v11 }
 0x10d   : > { %v926_v28 = vpop.f32.mrb[8].mxu0  ;;  %v996_v30 = vpop.f32.mrb[8].mxu1 }
 0x10e   : > { %v2387_v29 = vpop.f32.mrb[9].mxu0  ;;  %2442 = vmatpush3.msra.mxu0 %v926_v28  ;;  %v2398_v31 = vpop.f32.mrb[9].mxu1  ;;  %2447 = vmatpush3.msra.mxu1 %v996_v30 }
 0x10f   : > { %2451 = vmatprep.subr.mxu0 %v2677_v11  ;;  %2456 = vmatprep.subr.mxu1 %v2677_v11 }
 0x115   : > { %v1066_v32 = vpop.f32.mrb[10].mxu0  ;;  %v3013_v33 = vpop.f32.mrb[10].mxu1 }
 0x116   : > { %v2409_v34 = vpop.f32.mrb[11].mxu0  ;;  %v2420_v35 = vpop.f32.mrb[11].mxu1 }
 0x1d4   : > { %v1213_v36 = vpop.f32.mrb[12].mxu0  ;;  %v1289_v37 = vpop.f32.mrb[12].mxu1 }
 0x1d5   : > { %v2425_v38 = vpop.f32.mrb[13].mxu0  ;;  %v1445_v39 = vsel %vm1140_vm2, %v1213_v36, -inf  ;;  %v2430_v40 = vpop.f32.mrb[13].mxu1  ;;  %v1448_v41 = vsel %vm1140_vm2, %v1289_v37, -inf }
 0x1d6   : > { %1446 = vmax.xlane.f32.xlu0 %v1445_v39 }
 0x1da   : > { %1449 = vmax.xlane.f32.xlu0 %v1448_v41  ;;  %v2200_v41 = vld [vmem:[%s3120_s5] ss:$0 sm:$0xff] }
 0x1dc   : > { %v1365_v42 = vpop.f32.mrb[14].mxu0  ;;  %v1441_v43 = vpop.f32.mrb[14].mxu1 }
 0x1dd   : > { %v2435_v44 = vpop.f32.mrb[15].mxu0  ;;  %v1451_v45 = vsel %vm1140_vm2, %v1365_v42, -inf  ;;  %v2440_v46 = vpop.f32.mrb[15].mxu1  ;;  %v1454_v47 = vsel %vm1140_vm2, %v1441_v43, -inf }
 0x1de   : > { %1452 = vmax.xlane.f32.xlu1 %v1451_v45 }
 0x1e2   : > { %1455 = vmax.xlane.f32.xlu1 %v1454_v47 }
 0x263   : > { %v1447_v48 = vpop.xlane.xlu0 %1446 }
 0x264   : > { %v1457_v49 = vsub.f32 %v1213_v36, %v1447_v48 }
 0x266   : > { %v1461_v50 = vmul.f32 1.442695, %v1457_v49 }
 0x267   : > { %v1450_v51 = vpop.xlane.xlu0 %1449 }
 0x268   : > { %2595 = vpow2.f32 %v1461_v50  ;;  %v1458_v52 = vsub.f32 %v1289_v37, %v1450_v51 }
 0x26a   : > { %v1463_v53 = vmul.f32 1.442695, %v1458_v52 }
 0x26b   : > { %v1453_v54 = vpop.xlane.xlu1 %1452 }
 0x26c   : > { %2597 = vpow2.f32 %v1463_v53  ;;  %v1459_v55 = vsub.f32 %v1365_v42, %v1453_v54 }
 0x26e   : > { %v1465_v56 = vmul.f32 1.442695, %v1459_v55 }
 0x26f   : > { %v1456_v57 = vpop.xlane.xlu1 %1455 }
 0x270   : > { %2599 = vpow2.f32 %v1465_v56  ;;  %v1460_v58 = vsub.f32 %v1441_v43, %v1456_v57 }
 0x272   : > { %v2596_v59 = vpop.eup %2595  ;;  %v1467_v60 = vmul.f32 1.442695, %v1460_v58 }
 0x273   : > { %v1469_v61 = vsel %vm1140_vm2, %v2596_v59, 0.0 }
 0x274   : > { %2601 = vpow2.f32 %v1467_v60  ;;  %1470 = vadd.xlane.f32.xlu0 %v1469_v61 }
 0x276   : > { %v2598_v62 = vpop.eup %2597 }
 0x277   : > { %v1472_v63 = vsel %vm1140_vm2, %v2598_v62, 0.0 }
 0x278   : > { %1473 = vadd.xlane.f32.xlu1 %v1472_v63 }
 0x27a   : > { %v2600_v0 = vpop.eup %2599 }
 0x27b   : > { %v1475_v1 = vsel %vm1140_vm2, %v2600_v0, 0.0 }
 0x27c   : > { %1476 = vadd.xlane.f32.xlu0 %v1475_v1 }
 0x27e   : > { %v2602_v2 = vpop.eup %2601 }
 0x27f   : > { %v1478_v4 = vsel %vm1140_vm2, %v2602_v2, 0.0 }
 0x280   : > { %1479 = vadd.xlane.f32.xlu1 %v1478_v4 }
 0x301   : > { %v1471_v5 = vpop.xlane.xlu0 %1470 }
 0x302   : > { %2603 = vrcp.f32 %v1471_v5 }
 0x305   : > { %v1474_v6 = vpop.xlane.xlu1 %1473 }
 0x306   : > { %2605 = vrcp.f32 %v1474_v6 }
 0x309   : > { %v1477_v7 = vpop.xlane.xlu0 %1476 }
 0x30a   : > { %2607 = vrcp.f32 %v1477_v7 }
 0x30c   : > { %v2604_v8 = vpop.eup %2603 }
 0x30d   : > { %v1485_v9 = vmul.f32 %v2604_v8, %v2596_v59  ;;  %v1480_v10 = vpop.xlane.xlu1 %1479 }
 0x30e   : > { %2609 = vrcp.f32 %v1480_v10 }
 0x30f   : > { %2444 = vmatmul.mubr.msk.f32.vlgmr.msra.gmra.mrb[16].mxu0 %vm1140_vm2, %v1485_v9 }
 0x310   : > { %v2606_v12 = vpop.eup %2605  ;;  %2452 = vmatpush3.msra.mxu0 %v1066_v32  ;;  %2453 = vmatprep.mubr.msk.f32.mxu0 %vm2676_vm0, %v2677_v11 }
 0x311   : > { %v1486_v3 = vmul.f32 %v2606_v12, %v2598_v62  ;;  %2461 = vmatprep.subr.mxu0 %v2677_v11 }
 0x313   : > { %2449 = vmatmul.mubr.msk.f32.vlgmr.msra.gmra.mrb[16].mxu1 %vm1140_vm2, %v1486_v3 }
 0x314   : > { %v2608_v13 = vpop.eup %2607  ;;  %2457 = vmatpush3.msra.mxu1 %v3013_v33  ;;  %2458 = vmatprep.mubr.msk.f32.mxu1 %vm2676_vm0, %v2677_v11 }
 0x315   : > { %v1487_v14 = vmul.f32 %v2608_v13, %v2600_v0  ;;  %2466 = vmatprep.subr.mxu1 %v2677_v11 }
 0x317   : > { %2454 = vmatmul.mubr.msk.f32.vlgmr.msra.gmra.mrb[18].mxu0 %vm1140_vm2, %v1487_v14 }
 0x318   : > { %v2610_v15 = vpop.eup %2609  ;;  %2463 = vmatprep.mubr.msk.f32.mxu0 %vm2676_vm0, %v2677_v11  ;;  %2462 = vmatpush3.msra.mxu0 %v1781_v17 }
 0x319   : > { %v1488_v16 = vmul.f32 %v2610_v15, %v2602_v2  ;;  %2471 = vmatprep.subr.mxu0 %v2677_v11 }
 0x31b   : > { %2459 = vmatmul.mubr.msk.f32.vlgmr.msra.gmra.mrb[18].mxu1 %vm1140_vm2, %v1488_v16 }
 0x31c   : > { %2468 = vmatprep.mubr.msk.f32.mxu1 %vm2676_vm0, %v2677_v11  ;;  %2467 = vmatpush3.msra.mxu1 %v1782_v19 }
 0x31d   : > { %2476 = vmatprep.subr.mxu1 %v2677_v11 }
 0x3e2   : > { %v1558_v21 = vpop.f32.mrb[16].mxu0 }
 0x3e3   : > { %v2445_v22 = vpop.f32.mrb[17].mxu0  ;;  %2464 = vmatmul.mubr.msk.f32.vlgmr.msra.gmra.mrb[20].mxu0 %vm1140_vm2, %v1558_v21 }
 0x3e4   : > { %2472 = vmatpush3.msra.mxu0 %v1783_v20  ;;  %2473 = vmatprep.mubr.msk.f32.mxu0 %vm2676_vm0, %v2677_v11 }
 0x3e6   : > { %v1631_v18 = vpop.f32.mrb[16].mxu1 }
 0x3e7   : > { %v2450_v24 = vpop.f32.mrb[17].mxu1  ;;  %2469 = vmatmul.mubr.msk.f32.vlgmr.msra.gmra.mrb[20].mxu1 %vm1140_vm2, %v1631_v18 }
 0x3e8   : > { %2477 = vmatpush3.msra.mxu1 %v1784_v23  ;;  %2478 = vmatprep.mubr.msk.f32.mxu1 %vm2676_vm0, %v2677_v11 }
 0x3ea   : > { %v1704_v25 = vpop.f32.mrb[18].mxu0 }
 0x3eb   : > { %v2455_v26 = vpop.f32.mrb[19].mxu0  ;;  %2474 = vmatmul.mubr.msk.f32.vlgmr.msra.gmra.mrb[22].mxu0 %vm1140_vm2, %v1704_v25 }
 0x3ee   : > { %v1777_v27 = vpop.f32.mrb[18].mxu1 }
 0x3ef   : > { %v2460_v28 = vpop.f32.mrb[19].mxu1  ;;  %2479 = vmatmul.mubr.msk.f32.vlgmr.msra.gmra.mrb[22].mxu1 %vm1140_vm2, %v1777_v27 }
 0x4b6   : > { %v1854_v29 = vpop.f32.mrb[20].mxu0 }
 0x4b7   : > { %v2465_v30 = vpop.f32.mrb[21].mxu0  ;;  %v2077_v32 = vsel %vm264_vm1, %v1854_v29, 0.0 }
 0x4ba   : > { %v1927_v31 = vpop.f32.mrb[20].mxu1 }
 0x4bb   : > { %v2078_v33 = vsel %vm264_vm1, %v1927_v31, 0.0  ;;  %v2470_v34 = vpop.f32.mrb[21].mxu1 }
 0x4bc   : > { %v2079_v35 = vadd.f32 %v2078_v33, %v2077_v32 }
 0x4be   : > { %v2000_v11 = vpop.f32.mrb[22].mxu0 }
 0x4bf   : > { %v2080_v36 = vsel %vm264_vm1, %v2000_v11, 0.0  ;;  %v2475_v37 = vpop.f32.mrb[23].mxu0 }
 0x4c0   : > { %v2081_v38 = vadd.f32 %v2080_v36, %v2079_v35 }
 0x4c2   : > { %v2073_v39 = vpop.f32.mrb[22].mxu1 }
 0x4c3   : > { %v2082_v40 = vsel %vm264_vm1, %v2073_v39, 0.0  ;;  %v2480_v42 = vpop.f32.mrb[23].mxu1 }
 0x4c4   : > { %v2083_v43 = vadd.f32 %v2082_v40, %v2081_v38 }
 0x4c6   : > { %v2091_v44 = vadd.f32 %v2200_v41, %v2083_v43 }
 0x4c8   : > { %2092 = vst.msk [vmem:[%s242_s18] sm:$0xff] %vm264_vm1, %v2091_v44 }
 0x4c9   : > { %2624 = shalt.err (!%p2621_p3)
}
 0x4ca   : > { %s2625_s12 = scalar_lea.hbm %s3072_s28, 128  ;;  %s2629_s15 = scalar_lea.hbm %s3121_s6, 256 }
 0x4cb   : > { %p2626_p4 = scmp.ne.s32.totalorder %s3072_s28, %s2625_s12  ;;  %p2630_p9 = scmp.lt.u32.totalorder %s3072_s28, %s3121_s6 }
 0x4cc   : > { %p2631_p10 = scmp.lt.u32.totalorder %s2629_s15, %s2625_s12  ;;  %p2633_p12 = scmp.lt.u32.totalorder %s2625_s12, %s3072_s28 }
 0x4cd   : > { %p2627_p7 = pnand %p2626_p4, %p2752_p5 }
 0x4ce   : > { %p2632_p11 = por %p2631_p10, %p2630_p9 }
 0x4cf   : > { %p2628_p8 = pneg %p2627_p7 }
 0x4d0   : > { %p2634_p13 = por %p2633_p12, %p2632_p11 }
 0x4d2   : > { %p2635_p0 = pnand %p2634_p13, %p2628_p8 }
 0x4d4   : > { %2638 = shalt.err (!%p2635_p0)
}
 0x4d5   : > { %2553 = dma.vmem_to_hbm [thread:$0]  (%p2752_p5), %s3074_s19, 128, %s3072_s28, %s2094_s29  }
 0x4d6 PF: > { %p2559_p1 = scmp.ge.s32.totalorder %s2673_s24, 2  ;;  %s2119_s18 = sand.u32 1, %s2661_s21  }
 0x4d7   : > { %s2120_s20 = scalar_lea.sflag [#allocation3], %s2119_s18 }
 0x4d8   : > { %p2556_p2 = pnand %p2559_p1, %p2756_p6 }
 0x4da   : > { %2656 = dma.done.wait (!%p2556_p2), %s2120_s20, 128  }
 0x4db   : > { %2658 = vsyncadd (!%p2556_p2), %s2120_s20, 4294967168  ;;  %p16_p3 = scmp.ge.s32.totalorder %s2739_s27, 4   ;;  %s3124_s21 = smov %s2665_s22 }
 0x4dc   : > { %s3125_s22 = smov %s2669_s23  ;;  %s3126_s23 = smov %s2750_s30 }
 0x4dd   : > { %s3127_s24 = smov %s2739_s27  ;;  %18 = sbr.rel (!%p16_p3) target bundleno = 3 (0x3), region = 79 }
 0x4e4   :  { %2125 = vsyncpa [#allocation3], 1 }
 0x4e5   :  { %2127 = vsyncpa [#allocation3 + $0x1], 1 }

</bundles_post_ra>
